<compile_context>
chip_gen: v7x
topology: tpu7x:2x2x1
jax: 0.10.0
libtpu: 0.0.40
codegen_flags: <defaults>
</compile_context>

<pallas_src>
import functools

import jax
import jax.numpy as jnp
from jax.experimental import pallas as pl
from jax.experimental.pallas import tpu as pltpu


PAD_FEAT = 128  # lane-width pad for all hidden/output feature dims (max real dim is 40)


def _round_up(n, m):
    return ((n + m - 1) // m) * m


def _sigmoid(x):
    # 0.5 * tanh(0.5 x) + 0.5 == 1/(1+exp(-x)); tanh runs on the EUP slot and
    # avoids the f32 divide on the serial 5-layer critical path.  Weak-typed
    # constants keep the computation in x's dtype (bf16 on the fast path).
    return 0.5 * jnp.tanh(0.5 * x) + 0.5


def mlp_kernel(x_ref, w_ref, b_ref, o_ref, *, in_pad, n_layers, compute_dtype):
    """x_ref: (TB, in_pad); w_ref: (L, in_slab, 128); b_ref: (L, 1, 128); o_ref: (TB, 128)."""
    in_slab = w_ref.shape[1]
    h = x_ref[...].astype(compute_dtype)                 # (TB, in_pad)

    def layer(i, h, rows):
        w = w_ref[i] if rows == in_slab else w_ref[i, :rows, :]   # aligned sublane slice
        z = jnp.dot(h, w, preferred_element_type=jnp.float32)     # MXU, f32 accumulate
        return _sigmoid(z.astype(compute_dtype) + b_ref[i])       # bias + sigmoid in compute dtype

    h = layer(0, h, in_pad)                              # only first in_pad weight rows are real
    for i in range(1, n_layers):
        h = layer(i, h, PAD_FEAT)                        # full 128-wide padded matmuls

    # Lane-dense store: write all 128 lanes (padded lanes hold 0.5 garbage and
    # are sliced off in the wrapper) instead of a 1-lane masked store.
    o_ref[...] = h.astype(o_ref.dtype)


def _choose_batch_tiling(batch, batch_tile):
    """Return (tile, padded_batch).  Tile is a multiple of 8; padded_batch % tile == 0."""
    b8 = _round_up(max(batch, 1), 8)
    tb = _round_up(max(min(batch_tile, b8), 8), 8)
    if b8 > tb:
        return tb, _round_up(b8, tb)
    # A single tile covers everything.  If there is enough work, split into two
    # grid steps so the "parallel" axis can use both v7x TensorCores.
    if b8 >= 512:
        tb = _round_up((b8 + 1) // 2, 8)
        return tb, 2 * tb
    return b8, b8


def neural_network_forward(x, w_packed, b_packed, *, out_dim=1, batch_tile=2048):
    """x: (batch, input_size) f32.  w_packed: (L, in_slab, 128).  b_packed: (L, 1, 128).

    Compute dtype (MXU inputs + inter-layer activations) follows w_packed.dtype;
    accumulation is always f32.
    """
    batch, in_dim = x.shape
    n_layers, in_slab, _ = w_packed.shape
    compute_dtype = w_packed.dtype

    in_pad = _round_up(in_dim, 16)        # aligned layer-0 sublane slice for f32 AND bf16 slabs
    assert in_pad <= in_slab, "input_size exceeds the packed weight slab"

    tb, batch_padded = _choose_batch_tiling(batch, batch_tile)
    if batch_padded != batch or in_pad != in_dim:
        # Wrapper-side zero padding (rows to a tile multiple, cols to in_pad):
        # zero rows/cols are exact no-ops for the real outputs.
        x = jnp.pad(x, ((0, batch_padded - batch), (0, in_pad - in_dim)))

    grid = (batch_padded // tb,)

    # Scoped-VMEM estimate: double-buffered x/out blocks + resident params +
    # headroom for live (tb,128) f32 intermediates.  Only raise the limit when
    # the estimate exceeds v5e's 16 MiB scoped default.
    dsz = jnp.dtype(compute_dtype).itemsize
    est = (2 * tb * in_pad * 4 + 2 * tb * PAD_FEAT * 4
           + n_layers * in_slab * PAD_FEAT * dsz + n_layers * PAD_FEAT * dsz
           + 8 * tb * PAD_FEAT * 4)
    vmem_limit = min(int(est * 1.25), 64 * 1024 * 1024) if est > (14 << 20) else None

    kernel = functools.partial(mlp_kernel, in_pad=in_pad, n_layers=n_layers,
                               compute_dtype=compute_dtype)

    out = pl.pallas_call(
        kernel,
        out_shape=jax.ShapeDtypeStruct((batch_padded, PAD_FEAT), jnp.float32),
        grid_spec=pltpu.PrefetchScalarGridSpec(
            num_scalar_prefetch=0,
            grid=grid,
            in_specs=[
                pl.BlockSpec((tb, in_pad), lambda i: (i, 0)),                        # activations: tiled over batch
                pl.BlockSpec((n_layers, in_slab, PAD_FEAT), lambda i: (0, 0, 0)),    # weights: resident
                pl.BlockSpec((n_layers, 1, PAD_FEAT), lambda i: (0, 0, 0)),          # biases: resident
            ],
            out_specs=pl.BlockSpec((tb, PAD_FEAT), lambda i: (i, 0)),                # lane-dense output
        ),
        compiler_params=pltpu.CompilerParams(
            dimension_semantics=("parallel",),   # shards batch steps across v7x's 2 TCs
            vmem_limit_bytes=vmem_limit,
        ),
    )(x, w_packed, b_packed)

    return out[:batch, :out_dim]


def init_params(key, input_size, hidden1=40, hidden2=35, hidden3=30, hidden4=20):
    """PyTorch-style init.  W stored transposed as (in, out), b as (1, out)."""
    dims = [input_size, hidden1, hidden2, hidden3, hidden4, 1]
    params = []
    for i in range(len(dims) - 1):
        fan_in, fan_out = dims[i], dims[i + 1]
        key, kw, kb = jax.random.split(key, 3)
        bound = 1.0 / (fan_in ** 0.5)
        w = jax.random.uniform(kw, (fan_in, fan_out), jnp.float32, -bound, bound)
        b = jax.random.uniform(kb, (1, fan_out), jnp.float32, -bound, bound)
        params.append((w, b))
    return params, dims


def pack_params(params, *, dtype=jnp.bfloat16):
    """One-time packing: zero-pad each (in,out) weight / (1,out) bias to 128 lanes,
    stack over layers, and cast to the compute dtype (bf16 default)."""
    n = len(params)
    in_dim = params[0][0].shape[0]
    in_slab = max(PAD_FEAT, _round_up(in_dim, 16))
    w_packed = jnp.zeros((n, in_slab, PAD_FEAT), dtype)
    b_packed = jnp.zeros((n, 1, PAD_FEAT), dtype)
    for i, (w, b) in enumerate(params):
        assert w.shape[0] <= in_slab and w.shape[1] <= PAD_FEAT
        w_packed = w_packed.at[i, : w.shape[0], : w.shape[1]].set(w.astype(dtype))
        b_packed = b_packed.at[i, 0, : b.shape[-1]].set(b.reshape(-1).astype(dtype))
    return w_packed, b_packed


def reference_forward(x, params):
    h = x
    for w, b in params:
        h = jax.nn.sigmoid(h @ w + b)
    return h


if __name__ == "__main__":
    key = jax.random.PRNGKey(0)
    batch, input_size = 8, 16

    kx, kp = jax.random.split(key)
    x = jax.random.normal(kx, (batch, input_size), jnp.float32)
    params, dims = init_params(kp, input_size)

    ref = reference_forward(x, params)

    # Bit-exact validation path: f32 packed slabs (same semantics as the PyTorch module).
    w32, b32 = pack_params(params, dtype=jnp.float32)
    out32 = jax.block_until_ready(neural_network_forward(x, w32, b32))
    assert out32.shape == (batch, 1), out32.shape
    assert jnp.allclose(out32, ref, atol=1e-4, rtol=1e-4), (
        f"f32 max abs err {float(jnp.max(jnp.abs(out32 - ref)))}")

    # Default inference path: bf16 MXU inputs / bf16 activations, f32 accumulate.
    wbf, bbf = pack_params(params)  # bf16 by default
    outbf = jax.block_until_ready(neural_network_forward(x, wbf, bbf))
    assert outbf.shape == (batch, 1), outbf.shape
    assert jnp.allclose(outbf, ref, atol=3e-2, rtol=3e-2), (
        f"bf16 max abs err {float(jnp.max(jnp.abs(outbf - ref)))}")

    print("KERNEL_OK")
</pallas_src>

<mosaic_0001>
module attributes {stable_mosaic.version = 11 : i64} {
  func.func @mlp_kernel(%arg0: i32, %arg1: memref<8x16xf32, #tpu.memory_space<vmem>>, %arg2: memref<5x128x128xf32, #tpu.memory_space<vmem>>, %arg3: memref<5x1x128xf32, #tpu.memory_space<vmem>>, %arg4: memref<8x128xf32, #tpu.memory_space<vmem>>) attributes {dimension_semantics = [#tpu.dimension_semantics<parallel>], iteration_bounds = array<i64: 1>, scalar_prefetch = 0 : i64, scratch_operands = 0 : i64, tpu.core_type = #tpu.core_type<tc>, window_params = [{transform_indices = @transform_0, window_bounds = array<i64: 8, 16>}, {pipeline_mode = #tpu.pipeline_mode<synchronous>, transform_indices = @transform_1, window_bounds = array<i64: 5, 128, 128>}, {pipeline_mode = #tpu.pipeline_mode<synchronous>, transform_indices = @transform_2, window_bounds = array<i64: 5, 1, 128>}, {transform_indices = @transform_3, window_bounds = array<i64: 8, 128>}]} {
    %c0 = arith.constant 0 : index
    %c0_0 = arith.constant 0 : index
    %0 = vector.load %arg1[%c0, %c0_0] : memref<8x16xf32, #tpu.memory_space<vmem>>, vector<8x16xf32>
    %c0_1 = arith.constant 0 : index
    %c0_2 = arith.constant 0 : index
    %c0_3 = arith.constant 0 : index
    %1 = vector.load %arg2[%c0_1, %c0_2, %c0_3] : memref<5x128x128xf32, #tpu.memory_space<vmem>>, vector<1x16x128xf32>
    %2 = vector.shape_cast %1 : vector<1x16x128xf32> to vector<16x128xf32>
    %cst = arith.constant dense<0.000000e+00> : vector<8x128xf32>
    %3 = tpu.matmul %0, %2, %cst {dimension_numbers = #tpu.dot_dimension_numbers<[1], [0], [0], [1], [0, 0, 1, 1], [], []>} : vector<8x16xf32>, vector<16x128xf32>, vector<8x128xf32> -> vector<8x128xf32>
    %c0_4 = arith.constant 0 : index
    %c0_5 = arith.constant 0 : index
    %c0_6 = arith.constant 0 : index
    %4 = vector.load %arg3[%c0_4, %c0_5, %c0_6] : memref<5x1x128xf32, #tpu.memory_space<vmem>>, vector<1x1x128xf32>
    %5 = vector.shape_cast %4 : vector<1x1x128xf32> to vector<1x128xf32>
    %6 = vector.broadcast %5 : vector<1x128xf32> to vector<8x128xf32>
    %7 = arith.addf %3, %6 : vector<8x128xf32>
    %cst_7 = arith.constant 5.000000e-01 : f32
    %8 = vector.broadcast %cst_7 : f32 to vector<8x128xf32>
    %9 = arith.mulf %8, %7 : vector<8x128xf32>
    %10 = math.tanh %9 : vector<8x128xf32>
    %cst_8 = arith.constant 5.000000e-01 : f32
    %11 = vector.broadcast %cst_8 : f32 to vector<8x128xf32>
    %12 = arith.mulf %11, %10 : vector<8x128xf32>
    %cst_9 = arith.constant 5.000000e-01 : f32
    %13 = vector.broadcast %cst_9 : f32 to vector<8x128xf32>
    %14 = arith.addf %12, %13 : vector<8x128xf32>
    %c1 = arith.constant 1 : index
    %c0_10 = arith.constant 0 : index
    %c0_11 = arith.constant 0 : index
    %15 = vector.load %arg2[%c1, %c0_10, %c0_11] : memref<5x128x128xf32, #tpu.memory_space<vmem>>, vector<1x128x128xf32>
    %16 = vector.shape_cast %15 : vector<1x128x128xf32> to vector<128x128xf32>
    %cst_12 = arith.constant dense<0.000000e+00> : vector<8x128xf32>
    %17 = tpu.matmul %14, %16, %cst_12 {dimension_numbers = #tpu.dot_dimension_numbers<[1], [0], [0], [1], [0, 0, 1, 1], [], []>} : vector<8x128xf32>, vector<128x128xf32>, vector<8x128xf32> -> vector<8x128xf32>
    %c1_13 = arith.constant 1 : index
    %c0_14 = arith.constant 0 : index
    %c0_15 = arith.constant 0 : index
    %18 = vector.load %arg3[%c1_13, %c0_14, %c0_15] : memref<5x1x128xf32, #tpu.memory_space<vmem>>, vector<1x1x128xf32>
    %19 = vector.shape_cast %18 : vector<1x1x128xf32> to vector<1x128xf32>
    %20 = vector.broadcast %19 : vector<1x128xf32> to vector<8x128xf32>
    %21 = arith.addf %17, %20 : vector<8x128xf32>
    %cst_16 = arith.constant 5.000000e-01 : f32
    %22 = vector.broadcast %cst_16 : f32 to vector<8x128xf32>
    %23 = arith.mulf %22, %21 : vector<8x128xf32>
    %24 = math.tanh %23 : vector<8x128xf32>
    %cst_17 = arith.constant 5.000000e-01 : f32
    %25 = vector.broadcast %cst_17 : f32 to vector<8x128xf32>
    %26 = arith.mulf %25, %24 : vector<8x128xf32>
    %cst_18 = arith.constant 5.000000e-01 : f32
    %27 = vector.broadcast %cst_18 : f32 to vector<8x128xf32>
    %28 = arith.addf %26, %27 : vector<8x128xf32>
    %c2 = arith.constant 2 : index
    %c0_19 = arith.constant 0 : index
    %c0_20 = arith.constant 0 : index
    %29 = vector.load %arg2[%c2, %c0_19, %c0_20] : memref<5x128x128xf32, #tpu.memory_space<vmem>>, vector<1x128x128xf32>
    %30 = vector.shape_cast %29 : vector<1x128x128xf32> to vector<128x128xf32>
    %cst_21 = arith.constant dense<0.000000e+00> : vector<8x128xf32>
    %31 = tpu.matmul %28, %30, %cst_21 {dimension_numbers = #tpu.dot_dimension_numbers<[1], [0], [0], [1], [0, 0, 1, 1], [], []>} : vector<8x128xf32>, vector<128x128xf32>, vector<8x128xf32> -> vector<8x128xf32>
    %c2_22 = arith.constant 2 : index
    %c0_23 = arith.constant 0 : index
    %c0_24 = arith.constant 0 : index
    %32 = vector.load %arg3[%c2_22, %c0_23, %c0_24] : memref<5x1x128xf32, #tpu.memory_space<vmem>>, vector<1x1x128xf32>
    %33 = vector.shape_cast %32 : vector<1x1x128xf32> to vector<1x128xf32>
    %34 = vector.broadcast %33 : vector<1x128xf32> to vector<8x128xf32>
    %35 = arith.addf %31, %34 : vector<8x128xf32>
    %cst_25 = arith.constant 5.000000e-01 : f32
    %36 = vector.broadcast %cst_25 : f32 to vector<8x128xf32>
    %37 = arith.mulf %36, %35 : vector<8x128xf32>
    %38 = math.tanh %37 : vector<8x128xf32>
    %cst_26 = arith.constant 5.000000e-01 : f32
    %39 = vector.broadcast %cst_26 : f32 to vector<8x128xf32>
    %40 = arith.mulf %39, %38 : vector<8x128xf32>
    %cst_27 = arith.constant 5.000000e-01 : f32
    %41 = vector.broadcast %cst_27 : f32 to vector<8x128xf32>
    %42 = arith.addf %40, %41 : vector<8x128xf32>
    %c3 = arith.constant 3 : index
    %c0_28 = arith.constant 0 : index
    %c0_29 = arith.constant 0 : index
    %43 = vector.load %arg2[%c3, %c0_28, %c0_29] : memref<5x128x128xf32, #tpu.memory_space<vmem>>, vector<1x128x128xf32>
    %44 = vector.shape_cast %43 : vector<1x128x128xf32> to vector<128x128xf32>
    %cst_30 = arith.constant dense<0.000000e+00> : vector<8x128xf32>
    %45 = tpu.matmul %42, %44, %cst_30 {dimension_numbers = #tpu.dot_dimension_numbers<[1], [0], [0], [1], [0, 0, 1, 1], [], []>} : vector<8x128xf32>, vector<128x128xf32>, vector<8x128xf32> -> vector<8x128xf32>
    %c3_31 = arith.constant 3 : index
    %c0_32 = arith.constant 0 : index
    %c0_33 = arith.constant 0 : index
    %46 = vector.load %arg3[%c3_31, %c0_32, %c0_33] : memref<5x1x128xf32, #tpu.memory_space<vmem>>, vector<1x1x128xf32>
    %47 = vector.shape_cast %46 : vector<1x1x128xf32> to vector<1x128xf32>
    %48 = vector.broadcast %47 : vector<1x128xf32> to vector<8x128xf32>
    %49 = arith.addf %45, %48 : vector<8x128xf32>
    %cst_34 = arith.constant 5.000000e-01 : f32
    %50 = vector.broadcast %cst_34 : f32 to vector<8x128xf32>
    %51 = arith.mulf %50, %49 : vector<8x128xf32>
    %52 = math.tanh %51 : vector<8x128xf32>
    %cst_35 = arith.constant 5.000000e-01 : f32
    %53 = vector.broadcast %cst_35 : f32 to vector<8x128xf32>
    %54 = arith.mulf %53, %52 : vector<8x128xf32>
    %cst_36 = arith.constant 5.000000e-01 : f32
    %55 = vector.broadcast %cst_36 : f32 to vector<8x128xf32>
    %56 = arith.addf %54, %55 : vector<8x128xf32>
    %c4 = arith.constant 4 : index
    %c0_37 = arith.constant 0 : index
    %c0_38 = arith.constant 0 : index
    %57 = vector.load %arg2[%c4, %c0_37, %c0_38] : memref<5x128x128xf32, #tpu.memory_space<vmem>>, vector<1x128x128xf32>
    %58 = vector.shape_cast %57 : vector<1x128x128xf32> to vector<128x128xf32>
    %cst_39 = arith.constant dense<0.000000e+00> : vector<8x128xf32>
    %59 = tpu.matmul %56, %58, %cst_39 {dimension_numbers = #tpu.dot_dimension_numbers<[1], [0], [0], [1], [0, 0, 1, 1], [], []>} : vector<8x128xf32>, vector<128x128xf32>, vector<8x128xf32> -> vector<8x128xf32>
    %c4_40 = arith.constant 4 : index
    %c0_41 = arith.constant 0 : index
    %c0_42 = arith.constant 0 : index
    %60 = vector.load %arg3[%c4_40, %c0_41, %c0_42] : memref<5x1x128xf32, #tpu.memory_space<vmem>>, vector<1x1x128xf32>
    %61 = vector.shape_cast %60 : vector<1x1x128xf32> to vector<1x128xf32>
    %62 = vector.broadcast %61 : vector<1x128xf32> to vector<8x128xf32>
    %63 = arith.addf %59, %62 : vector<8x128xf32>
    %cst_43 = arith.constant 5.000000e-01 : f32
    %64 = vector.broadcast %cst_43 : f32 to vector<8x128xf32>
    %65 = arith.mulf %64, %63 : vector<8x128xf32>
    %66 = math.tanh %65 : vector<8x128xf32>
    %cst_44 = arith.constant 5.000000e-01 : f32
    %67 = vector.broadcast %cst_44 : f32 to vector<8x128xf32>
    %68 = arith.mulf %67, %66 : vector<8x128xf32>
    %cst_45 = arith.constant 5.000000e-01 : f32
    %69 = vector.broadcast %cst_45 : f32 to vector<8x128xf32>
    %70 = arith.addf %68, %69 : vector<8x128xf32>
    %c0_46 = arith.constant 0 : index
    %c0_47 = arith.constant 0 : index
    %71 = vector.load %arg4[%c0_46, %c0_47] : memref<8x128xf32, #tpu.memory_space<vmem>>, vector<8x128xf32>
    tpu.vector_store %arg4[%c0_46, %c0_47], %70 {strides = array<i32>} : memref<8x128xf32, #tpu.memory_space<vmem>>, vector<8x128xf32>,
    return
  }
  func.func @transform_0(%arg0: i32) -> (i32, i32) {
    %c0_i32 = arith.constant 0 : i32
    %c0_i32_0 = arith.constant 0 : i32
    return %arg0, %c0_i32 : i32, i32
  }
  func.func @transform_1(%arg0: i32) -> (i32, i32, i32) {
    %c0_i32 = arith.constant 0 : i32
    %c0_i32_0 = arith.constant 0 : i32
    %c0_i32_1 = arith.constant 0 : i32
    %c0_i32_2 = arith.constant 0 : i32
    return %c0_i32, %c0_i32_0, %c0_i32_1 : i32, i32, i32
  }
  func.func @transform_2(%arg0: i32) -> (i32, i32, i32) {
    %c0_i32 = arith.constant 0 : i32
    %c0_i32_0 = arith.constant 0 : i32
    %c0_i32_1 = arith.constant 0 : i32
    %c0_i32_2 = arith.constant 0 : i32
    return %c0_i32, %c0_i32_0, %c0_i32_1 : i32, i32, i32
  }
  func.func @transform_3(%arg0: i32) -> (i32, i32) {
    %c0_i32 = arith.constant 0 : i32
    %c0_i32_0 = arith.constant 0 : i32
    return %arg0, %c0_i32 : i32, i32
  }
}

</mosaic_0001>

<bundles_post_ra>
// kernel: tpu_custom_call.1
= control target key start
LH: loop header
LB: loop body
LE: loop exit
PB: predicated region body
PF: predicated region fallthrough
CT: control target
= control target key end

     0   :  { %8 = vsyncpa [#allocation3], 0  ;;  %s1088_s0 = inlined_call_operand.hbm [shape: f32[8,16], index: 0, kind: input, shape index: {}]   ;;  %s1089_s1 = inlined_call_operand.hbm [shape: f32[5,128,128], index: 1, kind: input, shape index: {}]   ;;  %s1090_s2 = inlined_call_operand.vmem [shape: f32[5,1,128], index: 2, kind: input, shape index: {}]   ;;  %s1091_s3 = inlined_call_operand.hbm [shape: f32[8,128], index: 3, kind: output, shape index: {}]  }
   0x1   :  { %9 = vsyncpa [#allocation6], 0 }
   0x2   :  { %10 = vsyncpa [#allocation4], 0  ;;  %s959_s12 = smov [#allocation2]   ;;  %s960_s14 = smov [#allocation5]  }
   0x3   :  { %s17_s13 = sshll.u32 %s959_s12, 4  ;;  %s26_s15 = sshll.u32 %s960_s14, 4  ;;  %s18_s13 = int_to_ptr.vmem [resolvable:$true] %s17_s13  ;;  %s987_s15 = int_to_ptr.vmem [resolvable:$true] %s26_s15 }
   0x4   :  { %s887_s18 = scalar_lea.hbm %s1088_s0, 128 }
   0x5   :  { %p888_p0 = scmp.ne.s32.totalorder %s1088_s0, %s887_s18  ;;  %p891_p1 = scmp.lt.u32.totalorder %s887_s18, %s1088_s0 }
   0x7   :  { %p893_p2 = pnand %p891_p1, %p888_p0 }
   0x9   :  { %896 = shalt.err (!%p893_p2)
}
   0xa   :  { %s897_s23 = scalar_lea.vmem %s18_s13, 128  ;;  %p902_p4 = scmp.lt.s32.totalorder %s18_s13, %s18_s13 }
   0xb   :  { %p898_p3 = scmp.ne.s32.totalorder %s18_s13, %s897_s23  ;;  %p903_p5 = scmp.lt.s32.totalorder %s897_s23, %s897_s23 }
   0xd   :  { %p904_p6 = por %p903_p5, %p902_p4 }
   0xf   :  { %p905_p7 = pnand %p904_p6, %p898_p3 }
  0x11   :  { %908 = shalt.err (!%p905_p7)
}
  0x12   :  { %20 = dma.hbm_to_vmem [thread:$0]  %s1088_s0, 128, %s18_s13, [#allocation3]  }
  0x13   :  { %s909_s28 = scalar_lea.hbm %s1089_s1, 10240 }
  0x14   :  { %p910_p8 = scmp.ne.s32.totalorder %s1089_s1, %s909_s28  ;;  %p913_p9 = scmp.lt.u32.totalorder %s909_s28, %s1089_s1 }
  0x16   :  { %p915_p10 = pnand %p913_p9, %p910_p8 }
  0x18   :  { %918 = shalt.err (!%p915_p10)
}
  0x19   :  { %s919_s6 = scalar_lea.vmem %s987_s15, 10240  ;;  %p924_p12 = scmp.lt.s32.totalorder %s987_s15, %s987_s15 }
  0x1a   :  { %p920_p11 = scmp.ne.s32.totalorder %s987_s15, %s919_s6  ;;  %p925_p13 = scmp.lt.s32.totalorder %s919_s6, %s919_s6 }
  0x1c   :  { %p926_p0 = por %p925_p13, %p924_p12 }
  0x1e   :  { %p927_p1 = pnand %p926_p0, %p920_p11 }
  0x20   :  { %930 = shalt.err (!%p927_p1)
}
  0x21   :  { %s961_s0 = smov 128   ;;  %s962_s7 = smov 8  }
  0x22   :  { %32 = dma.hbm_to_vmem [thread:$0]  %s1089_s1, 10240, %s987_s15, [#allocation6], %s961_s0, %s961_s0, %s962_s7  }
  0x23   :  { %953 = dma.done.wait [#allocation3], 128  }
  0x24   :  { %954 = vsyncadd [#allocation3], 4294967168 }
  0x25   :  { %955 = dma.done.wait [#allocation6], 10240  }
  0x26   :  { %956 = vsyncadd [#allocation6], 4294957056  ;;  %v963_v0 = vmov 0.0|0.0   ;;  %vm964_vm0 = vmmov 0   ;;  %v965_v1 = vmov 0.0   ;;  %v42_v2 = vld [vmem:[#allocation5] sm:$0xff] }
  0x27   :  { %770 = vmatprep.subr.bf16.mxu0 %v963_v0  ;;  %627 = vmatprep.mubr.msk.f32.mxu0 %vm964_vm0, %v965_v1  ;;  %v43_v3 = vld [vmem:[#allocation5 + $0x8] sm:$0xff]  ;;  %v130_v5 = vld [vmem:[#allocation5 + $0x80] sm:$0xff]  ;;  %v132_v7 = vld [vmem:[#allocation5 + $0x90] sm:$0xff]  ;;  %vm51_vm1 = vcmask 130048   ;;  %s966_s19 = smov [#allocation7]  }
  0x28   :  { %773 = vmatprep.subr.bf16.mxu1 %v963_v0  ;;  %662 = vmatprep.mubr.msk.f32.mxu1 %vm964_vm0, %v965_v1  ;;  %v771_v4 = vpack.c.bf16 %v43_v3, %v42_v2  ;;  %v131_v6 = vld [vmem:[#allocation5 + $0x88] sm:$0xff]  ;;  %v133_v9 = vld [vmem:[#allocation5 + $0x98] sm:$0xff]  ;;  %v134_v12 = vld [vmem:[#allocation5 + $0xa0] sm:$0xff]  ;;  %s532_s20 = sshll.u32 %s966_s19, 4  ;;  %s533_s20 = int_to_ptr.vmem [resolvable:$true] %s532_s20 }
  0x29   :  { %v774_v8 = vpack.c.bf16 %v131_v6, %v130_v5  ;;  %v41_v10 = vld [vmem:[#allocation2] sm:$0xff]  ;;  %v777_v11 = vpack.c.bf16 %v133_v9, %v132_v7  ;;  %v135_v13 = vld [vmem:[#allocation5 + $0xa8] sm:$0xff]  ;;  %v136_v15 = vld [vmem:[#allocation5 + $0xb0] sm:$0xff]  ;;  %s931_s21 = scalar_lea.vmem %s533_s20, 128  ;;  %p936_p3 = scmp.lt.s32.totalorder %s533_s20, %s533_s20 }
  0x2a   :  { %772 = vmatpush3.bf16.msra.mxu0 %v771_v4  ;;  %v780_v14 = vpack.c.bf16 %v135_v13, %v134_v12  ;;  %v137_v16 = vld [vmem:[#allocation5 + $0xb8] sm:$0xff]  ;;  %v138_v18 = vld [vmem:[#allocation5 + $0xc0] sm:$0xff]  ;;  %v139_v19 = vld [vmem:[#allocation5 + $0xc8] sm:$0xff]  ;;  %p932_p2 = scmp.ne.s32.totalorder %s533_s20, %s931_s21  ;;  %p937_p4 = scmp.lt.s32.totalorder %s931_s21, %s931_s21 }
  0x2b   :  { %775 = vmatpush3.bf16.msra.mxu1 %v774_v8  ;;  %797 = vmatprep.subr.bf16.mxu0 %v963_v0  ;;  %v783_v17 = vpack.c.bf16 %v137_v16, %v136_v15  ;;  %v786_v20 = vpack.c.bf16 %v139_v19, %v138_v18  ;;  %v140_v21 = vld [vmem:[#allocation5 + $0xd0] sm:$0xff]  ;;  %v141_v22 = vld [vmem:[#allocation5 + $0xd8] sm:$0xff]  ;;  %v142_v24 = vld [vmem:[#allocation5 + $0xe0] sm:$0xff] }
  0x2c   :  { %776 = vmatprep.subr.bf16.mxu1 %v963_v0  ;;  %v789_v23 = vpack.c.bf16 %v141_v22, %v140_v21  ;;  %v143_v25 = vld [vmem:[#allocation5 + $0xe8] sm:$0xff]  ;;  %v144_v27 = vld [vmem:[#allocation5 + $0xf0] sm:$0xff]  ;;  %v145_v28 = vld [vmem:[#allocation5 + $0xf8] sm:$0xff]  ;;  %p938_p5 = por %p937_p4, %p936_p3 }
  0x2d   :  { %628 = vmatmul.mubr.msk.f32.vlgmr.msra.gmra.mrb[0].mxu0 %vm51_vm1, %v41_v10  ;;  %v792_v26 = vpack.c.bf16 %v143_v25, %v142_v24  ;;  %v795_v29 = vpack.c.bf16 %v145_v28, %v144_v27  ;;  %v229_v30 = vld [vmem:[#allocation5 + $0x100] sm:$0xff]  ;;  %v230_v31 = vld [vmem:[#allocation5 + $0x108] sm:$0xff]  ;;  %v231_v32 = vld [vmem:[#allocation5 + $0x110] sm:$0xff] }
  0x2e   :  { %697 = vmatprep.mubr.msk.f32.mxu0 %vm964_vm0, %v965_v1  ;;  %v798_v33 = vpack.c.bf16 %v230_v31, %v229_v30  ;;  %v232_v34 = vld [vmem:[#allocation5 + $0x118] sm:$0xff]  ;;  %v233_v36 = vld [vmem:[#allocation5 + $0x120] sm:$0xff]  ;;  %v234_v37 = vld [vmem:[#allocation5 + $0x128] sm:$0xff]  ;;  %p939_p6 = pnand %p938_p5, %p932_p2 }
  0x2f   :  { %778 = vmatpush3.bf16.msra.mxu1 %v777_v11  ;;  %v801_v35 = vpack.c.bf16 %v232_v34, %v231_v32  ;;  %v804_v38 = vpack.c.bf16 %v234_v37, %v233_v36  ;;  %v542_v39 = vld [vmem:[%s1090_s2] ss:$0 sm:$0xff]  ;;  %v235_v47 = vld [vmem:[#allocation5 + $0x130] sm:$0xff]  ;;  %v237_v50 = vld [vmem:[#allocation5 + $0x140] sm:$0xff] }
  0x30   :  { %779 = vmatprep.subr.bf16.mxu1 %v963_v0  ;;  %799 = vmatpush3.bf16.msra.mxu0 %v798_v33  ;;  %v236_v48 = vld [vmem:[#allocation5 + $0x138] sm:$0xff]  ;;  %v238_v51 = vld [vmem:[#allocation5 + $0x148] sm:$0xff]  ;;  %v239_v53 = vld [vmem:[#allocation5 + $0x150] sm:$0xff] }
  0x31   :  { %800 = vmatprep.subr.bf16.mxu0 %v963_v0  ;;  %v807_v49 = vpack.c.bf16 %v236_v48, %v235_v47  ;;  %v810_v52 = vpack.c.bf16 %v238_v51, %v237_v50  ;;  %v240_v54 = vld [vmem:[#allocation5 + $0x158] sm:$0xff]  ;;  %v241_v56 = vld [vmem:[#allocation5 + $0x160] sm:$0xff]  ;;  %v242_v57 = vld [vmem:[#allocation5 + $0x168] sm:$0xff] }
  0x32   :  { %v813_v55 = vpack.c.bf16 %v240_v54, %v239_v53  ;;  %v816_v58 = vpack.c.bf16 %v242_v57, %v241_v56  ;;  %v243_v59 = vld [vmem:[#allocation5 + $0x170] sm:$0xff]  ;;  %v244_v60 = vld [vmem:[#allocation5 + $0x178] sm:$0xff]  ;;  %v328_v62 = vld [vmem:[#allocation5 + $0x180] sm:$0xff] }
  0x33   :  { %781 = vmatpush3.bf16.msra.mxu1 %v780_v14  ;;  %v819_v61 = vpack.c.bf16 %v244_v60, %v243_v59  ;;  %v329_v63 = vld [vmem:[#allocation5 + $0x188] sm:$0xff]  ;;  %v330_v2 = vld [vmem:[#allocation5 + $0x190] sm:$0xff]  ;;  %v331_v4 = vld [vmem:[#allocation5 + $0x198] sm:$0xff] }
  0x34   :  { %782 = vmatprep.subr.bf16.mxu1 %v963_v0  ;;  %802 = vmatpush3.bf16.msra.mxu0 %v801_v35  ;;  %v822_v3 = vpack.c.bf16 %v329_v63, %v328_v62  ;;  %v825_v5 = vpack.c.bf16 %v331_v4, %v330_v2  ;;  %v332_v6 = vld [vmem:[#allocation5 + $0x1a0] sm:$0xff]  ;;  %v333_v7 = vld [vmem:[#allocation5 + $0x1a8] sm:$0xff]  ;;  %v545_v9 = vld [vmem:[%s1090_s2 + $0x1] ss:$0 sm:$0xff] }
  0x35   :  { %803 = vmatprep.subr.bf16.mxu0 %v963_v0  ;;  %v828_v8 = vpack.c.bf16 %v333_v7, %v332_v6  ;;  %v335_v18 = vld [vmem:[#allocation5 + $0x1b8] sm:$0xff]  ;;  %v337_v21 = vld [vmem:[#allocation5 + $0x1c8] sm:$0xff]  ;;  %v342_v28 = vld [vmem:[#allocation5 + $0x1f0] sm:$0xff] }
  0x36   :  { %v339_v24 = vld [vmem:[#allocation5 + $0x1d8] sm:$0xff]  ;;  %v427_v31 = vld [vmem:[#allocation5 + $0x200] sm:$0xff]  ;;  %v428_v32 = vld [vmem:[#allocation5 + $0x208] sm:$0xff] }
  0x37   :  { %784 = vmatpush3.bf16.msra.mxu1 %v783_v17  ;;  %v334_v17 = vld [vmem:[#allocation5 + $0x1b0] sm:$0xff]  ;;  %v846_v34 = vpack.c.bf16 %v428_v32, %v427_v31  ;;  %v430_v35 = vld [vmem:[#allocation5 + $0x218] sm:$0xff]  ;;  %v431_v37 = vld [vmem:[#allocation5 + $0x220] sm:$0xff] }
  0x38   :  { %785 = vmatprep.subr.bf16.mxu1 %v963_v0  ;;  %805 = vmatpush3.bf16.msra.mxu0 %v804_v38  ;;  %v831_v19 = vpack.c.bf16 %v335_v18, %v334_v17  ;;  %v429_v33 = vld [vmem:[#allocation5 + $0x210] sm:$0xff]  ;;  %v432_v38 = vld [vmem:[#allocation5 + $0x228] sm:$0xff]  ;;  %v435_v51 = vld [vmem:[#allocation5 + $0x240] sm:$0xff] }
  0x39   :  { %806 = vmatprep.subr.bf16.mxu0 %v963_v0  ;;  %v849_v36 = vpack.c.bf16 %v430_v35, %v429_v33  ;;  %v433_v48 = vld [vmem:[#allocation5 + $0x230] sm:$0xff]  ;;  %v439_v57 = vld [vmem:[#allocation5 + $0x260] sm:$0xff]  ;;  %v549_v63 = vld [vmem:[%s1090_s2 + $0x3] ss:$0 sm:$0xff] }
  0x3a   :  { %v437_v54 = vld [vmem:[#allocation5 + $0x250] sm:$0xff] }
  0x3b   :  { %787 = vmatpush3.bf16.msra.mxu1 %v786_v20  ;;  %v336_v20 = vld [vmem:[#allocation5 + $0x1c0] sm:$0xff]  ;;  %v441_v60 = vld [vmem:[#allocation5 + $0x270] sm:$0xff] }
  0x3c   :  { %788 = vmatprep.subr.bf16.mxu1 %v963_v0  ;;  %808 = vmatpush3.bf16.msra.mxu0 %v807_v49  ;;  %v834_v22 = vpack.c.bf16 %v337_v21, %v336_v20  ;;  %v434_v49 = vld [vmem:[#allocation5 + $0x238] sm:$0xff] }
  0x3d   :  { %809 = vmatprep.subr.bf16.mxu0 %v963_v0  ;;  %v855_v50 = vpack.c.bf16 %v434_v49, %v433_v48 }
  0x3f   :  { %790 = vmatpush3.bf16.msra.mxu1 %v789_v23  ;;  %v338_v23 = vld [vmem:[#allocation5 + $0x1d0] sm:$0xff] }
  0x40   :  { %791 = vmatprep.subr.bf16.mxu1 %v963_v0  ;;  %811 = vmatpush3.bf16.msra.mxu0 %v810_v52  ;;  %v837_v25 = vpack.c.bf16 %v339_v24, %v338_v23  ;;  %v436_v52 = vld [vmem:[#allocation5 + $0x248] sm:$0xff] }
  0x41   :  { %812 = vmatprep.subr.bf16.mxu0 %v963_v0  ;;  %v858_v53 = vpack.c.bf16 %v436_v52, %v435_v51 }
  0x43   :  { %793 = vmatpush3.bf16.msra.mxu1 %v792_v26  ;;  %v340_v26 = vld [vmem:[#allocation5 + $0x1e0] sm:$0xff] }
  0x44   :  { %794 = vmatprep.subr.bf16.mxu1 %v963_v0  ;;  %814 = vmatpush3.bf16.msra.mxu0 %v813_v55  ;;  %v438_v55 = vld [vmem:[#allocation5 + $0x258] sm:$0xff] }
  0x45   :  { %815 = vmatprep.subr.bf16.mxu0 %v963_v0  ;;  %v861_v56 = vpack.c.bf16 %v438_v55, %v437_v54 }
  0x47   :  { %796 = vmatpush3.bf16.msra.mxu1 %v795_v29  ;;  %v343_v29 = vld [vmem:[#allocation5 + $0x1f8] sm:$0xff] }
  0x48   :  { %821 = vmatprep.subr.bf16.mxu1 %v963_v0  ;;  %817 = vmatpush3.bf16.msra.mxu0 %v816_v58  ;;  %v843_v30 = vpack.c.bf16 %v343_v29, %v342_v28  ;;  %v440_v58 = vld [vmem:[#allocation5 + $0x268] sm:$0xff] }
  0x49   :  { %818 = vmatprep.subr.bf16.mxu0 %v963_v0  ;;  %v864_v59 = vpack.c.bf16 %v440_v58, %v439_v57 }
  0x4c   :  { %820 = vmatpush3.bf16.msra.mxu0 %v819_v61  ;;  %v442_v61 = vld [vmem:[#allocation5 + $0x278] sm:$0xff] }
  0x4d   :  { %845 = vmatprep.subr.bf16.mxu0 %v963_v0  ;;  %v867_v62 = vpack.c.bf16 %v442_v61, %v441_v60 }
 0x100   :  { %v121_v40 = vpop.f32.mrb[0].mxu0 }
 0x101   :  { %v122_v41 = vadd.f32 %v542_v39, %v121_v40  ;;  %v629_v42 = vpop.f32.mrb[1].mxu0  ;;  %v852_v39 = vpack.c.bf16 %v432_v38, %v431_v37  ;;  %v547_v40 = vld [vmem:[%s1090_s2 + $0x2] ss:$0 sm:$0xff] }
 0x103   :  { %v125_v43 = vmul.f32 0.5, %v122_v41 }
 0x105   :  { %877 = vtanh.f32 %v125_v43 }
 0x10f   :  { %v878_v44 = vpop.eup %877 }
 0x110   :  { %v127_v45 = vmul.f32 0.5, %v878_v44 }
 0x112   :  { %v128_v46 = vadd.f32 0.5, %v127_v45 }
 0x114   :  { %663 = vmatmul.mubr.f32.vlgmr.msra.gmra.mrb[0].mxu1 %v128_v46 }
 0x115   :  { %732 = vmatprep.mubr.msk.f32.mxu1 %vm964_vm0, %v965_v1  ;;  %823 = vmatpush3.bf16.msra.mxu1 %v822_v3 }
 0x116   :  { %824 = vmatprep.subr.bf16.mxu1 %v963_v0 }
 0x119   :  { %826 = vmatpush3.bf16.msra.mxu1 %v825_v5 }
 0x11a   :  { %827 = vmatprep.subr.bf16.mxu1 %v963_v0 }
 0x11d   :  { %829 = vmatpush3.bf16.msra.mxu1 %v828_v8 }
 0x11e   :  { %830 = vmatprep.subr.bf16.mxu1 %v963_v0 }
 0x121   :  { %832 = vmatpush3.bf16.msra.mxu1 %v831_v19 }
 0x122   :  { %833 = vmatprep.subr.bf16.mxu1 %v963_v0 }
 0x125   :  { %835 = vmatpush3.bf16.msra.mxu1 %v834_v22 }
 0x126   :  { %836 = vmatprep.subr.bf16.mxu1 %v963_v0 }
 0x129   :  { %838 = vmatpush3.bf16.msra.mxu1 %v837_v25 }
 0x12a   :  { %839 = vmatprep.subr.bf16.mxu1 %v963_v0 }
 0x1e7   :  { %v220_v10 = vpop.f32.mrb[0].mxu1 }
 0x1e8   :  { %v221_v11 = vadd.f32 %v545_v9, %v220_v10  ;;  %v664_v12 = vpop.f32.mrb[1].mxu1 }
 0x1ea   :  { %v224_v13 = vmul.f32 0.5, %v221_v11 }
 0x1ec   :  { %879 = vtanh.f32 %v224_v13 }
 0x1f6   :  { %v880_v14 = vpop.eup %879 }
 0x1f7   :  { %v226_v15 = vmul.f32 0.5, %v880_v14 }
 0x1f9   :  { %v227_v16 = vadd.f32 0.5, %v226_v15 }
 0x1fb   :  { %698 = vmatmul.mubr.f32.vlgmr.msra.gmra.mrb[2].mxu0 %v227_v16 }
 0x1fc   :  { %767 = vmatprep.mubr.msk.f32.mxu0 %vm964_vm0, %v965_v1  ;;  %v341_v1 = vld [vmem:[#allocation5 + $0x1e8] sm:$0xff]  ;;  %847 = vmatpush3.bf16.msra.mxu0 %v846_v34 }
 0x1fd   :  { %v840_v27 = vpack.c.bf16 %v341_v1, %v340_v26  ;;  %848 = vmatprep.subr.bf16.mxu0 %v963_v0 }
 0x1ff   :  { %841 = vmatpush3.bf16.msra.mxu1 %v840_v27 }
 0x200   :  { %842 = vmatprep.subr.bf16.mxu1 %v963_v0  ;;  %850 = vmatpush3.bf16.msra.mxu0 %v849_v36 }
 0x201   :  { %851 = vmatprep.subr.bf16.mxu0 %v963_v0 }
 0x203   :  { %844 = vmatpush3.bf16.msra.mxu1 %v843_v30 }
 0x204   :  { %853 = vmatpush3.bf16.msra.mxu0 %v852_v39 }
 0x205   :  { %854 = vmatprep.subr.bf16.mxu0 %v963_v0 }
 0x208   :  { %856 = vmatpush3.bf16.msra.mxu0 %v855_v50 }
 0x209   :  { %857 = vmatprep.subr.bf16.mxu0 %v963_v0 }
 0x20c   :  { %859 = vmatpush3.bf16.msra.mxu0 %v858_v53 }
 0x20d   :  { %860 = vmatprep.subr.bf16.mxu0 %v963_v0 }
 0x210   :  { %862 = vmatpush3.bf16.msra.mxu0 %v861_v56 }
 0x211   :  { %863 = vmatprep.subr.bf16.mxu0 %v963_v0 }
 0x214   :  { %865 = vmatpush3.bf16.msra.mxu0 %v864_v59 }
 0x215   :  { %866 = vmatprep.subr.bf16.mxu0 %v963_v0  ;;  %v551_v0 = vld [vmem:[%s1090_s2 + $0x4] ss:$0 sm:$0xff] }
 0x218   :  { %868 = vmatpush3.bf16.msra.mxu0 %v867_v62 }
 0x2ce   :  { %v319_v41 = vpop.f32.mrb[2].mxu0 }
 0x2cf   :  { %v320_v42 = vadd.f32 %v547_v40, %v319_v41  ;;  %v699_v43 = vpop.f32.mrb[3].mxu0 }
 0x2d1   :  { %v323_v44 = vmul.f32 0.5, %v320_v42 }
 0x2d3   :  { %881 = vtanh.f32 %v323_v44 }
 0x2dd   :  { %v882_v45 = vpop.eup %881 }
 0x2de   :  { %v325_v46 = vmul.f32 0.5, %v882_v45 }
 0x2e0   :  { %v326_v47 = vadd.f32 0.5, %v325_v46 }
 0x2e2   :  { %733 = vmatmul.mubr.f32.vlgmr.msra.gmra.mrb[2].mxu1 %v326_v47 }
 0x3b5   :  { %v418_v2 = vpop.f32.mrb[2].mxu1 }
 0x3b6   :  { %v419_v3 = vadd.f32 %v549_v63, %v418_v2  ;;  %v734_v4 = vpop.f32.mrb[3].mxu1 }
 0x3b8   :  { %v422_v5 = vmul.f32 0.5, %v419_v3 }
 0x3ba   :  { %883 = vtanh.f32 %v422_v5 }
 0x3c4   :  { %v884_v6 = vpop.eup %883 }
 0x3c5   :  { %v424_v7 = vmul.f32 0.5, %v884_v6 }
 0x3c7   :  { %v425_v8 = vadd.f32 0.5, %v424_v7 }
 0x3c9   :  { %768 = vmatmul.mubr.f32.vlgmr.msra.gmra.mrb[4].mxu0 %v425_v8 }
 0x49c   :  { %v517_v9 = vpop.f32.mrb[4].mxu0 }
 0x49d   :  { %v518_v10 = vadd.f32 %v551_v0, %v517_v9  ;;  %v769_v11 = vpop.f32.mrb[5].mxu0 }
 0x49f   :  { %v521_v12 = vmul.f32 0.5, %v518_v10 }
 0x4a1   :  { %885 = vtanh.f32 %v521_v12 }
 0x4ab   :  { %v886_v13 = vpop.eup %885 }
 0x4ac   :  { %v523_v14 = vmul.f32 0.5, %v886_v13 }
 0x4ae   :  { %v524_v15 = vadd.f32 0.5, %v523_v14 }
 0x4b0   :  { %525 = vst [vmem:[#allocation7] sm:$0xff] %v524_v15 }
 0x4b1   :  { %942 = shalt.err (!%p939_p6)
}
 0x4b2   :  { %s943_s23 = scalar_lea.hbm %s1091_s3, 128 }
 0x4b3   :  { %p944_p7 = scmp.ne.s32.totalorder %s1091_s3, %s943_s23  ;;  %p947_p8 = scmp.lt.u32.totalorder %s943_s23, %s1091_s3 }
 0x4b5   :  { %p949_p9 = pnand %p947_p8, %p944_p7 }
 0x4b7   :  { %952 = shalt.err (!%p949_p9)
}
 0x4b8   :  { %535 = dma.vmem_to_hbm [thread:$0]  %s533_s20, 128, %s1091_s3, [#allocation4]  }
 0x4b9   :  { %957 = dma.done.wait [#allocation4], 128  }
 0x4ba   :  { %958 = vsyncadd [#allocation4], 4294967168 }
 0x4bb   :  { %539 = vsyncpa [#allocation3], 1 }
 0x4bc   :  { %540 = vsyncpa [#allocation6], 1 }
 0x4bd   :  { %541 = vsyncpa [#allocation4], 1 }

</bundles_post_ra>
